<compile_context>
chip_gen: v5e
topology: v5e:2x2
jax: 0.10.0
libtpu: 0.0.40
codegen_flags: <defaults>
</compile_context>

<pallas_src>
import jax
import jax.numpy as jnp
from jax import lax
from jax.experimental import pallas as pl
from jax.experimental.pallas import tpu as pltpu


def mlp_kernel(x_ref, w1t_ref, p_ref, o_ref):
    # x_ref  : (tb, F)  f32 VMEM   -- streamed batch tile
    # w1t_ref: (8, F)   f32 VMEM   -- fc1 weights, transposed, zero-padded 4->8
    # p_ref  : (17,)    f32 SMEM   -- [b1(4) | w2 row-major(8) | b2(2) | w3(2) | b3(1)]
    # o_ref  : (1, tb)  f32 VMEM   -- lane-dense output row
    #
    # fc1 on the MXU, NT contraction: contract the F axis of both operands,
    # giving a batch-in-lanes (8, tb) result (rows 4..7 are zero padding).
    h1 = lax.dot_general(
        w1t_ref[...], x_ref[...],
        dimension_numbers=(((1,), (1,)), ((), ())),
        preferred_element_type=jnp.float32,
    )                                                         # (8, tb)

    # Bias + ReLU per neuron, kept as lane-dense (1, tb) rows (VPU).
    r = [jnp.maximum(h1[k:k + 1, :] + p_ref[k], 0.0) for k in range(4)]

    # fc2 (4 -> 2): scalar-broadcast MACs on the VPU.  w2[k, j] -> p[4 + 2k + j]
    h2 = []
    for j in range(2):
        acc = r[0] * p_ref[4 + j]
        for k in range(1, 4):
            acc = acc + r[k] * p_ref[4 + 2 * k + j]
        h2.append(jnp.maximum(acc + p_ref[12 + j], 0.0))       # (1, tb)

    # fc3 (2 -> 1): w3[0], w3[1], b3 at p[14], p[15], p[16].
    out = h2[0] * p_ref[14] + h2[1] * p_ref[15] + p_ref[16]    # (1, tb)
    o_ref[...] = out.astype(o_ref.dtype)


def mlp_forward(x, w1, b1, w2, b2, w3, b3, *, tile_b=4096):
    """Fused forward pass.  Weights stored as (in, out): y = x @ W + b."""
    B, F = x.shape

    if B <= tile_b:
        tb = B                      # single block == full array dims (always legal)
    else:
        # Multi-step grid: tb must be a multiple of 128 so the (1, tb) output
        # block and the (tb, F) input block satisfy the (8, 128) layout rule.
        assert tile_b % 128 == 0, "tile_b must be a multiple of 128"
        tb = tile_b
    grid = (pl.cdiv(B, tb),)        # partial trailing block handles ragged B

    # fc1 weights transposed to (4, F), zero-padded to (8, F) for sublane
    # alignment of the (8, tb) MXU result.
    w1t8 = jnp.pad(jnp.transpose(w1).astype(jnp.float32), ((0, 4), (0, 0)))

    # Pack the 17 tiny scalars into one SMEM vector.
    params = jnp.concatenate([
        jnp.ravel(b1), jnp.ravel(w2), jnp.ravel(b2), jnp.ravel(w3), jnp.ravel(b3),
    ]).astype(jnp.float32)          # (17,)

    out_row = pl.pallas_call(
        mlp_kernel,
        out_shape=jax.ShapeDtypeStruct((1, B), jnp.float32),
        grid_spec=pltpu.PrefetchScalarGridSpec(
            num_scalar_prefetch=0,
            grid=grid,
            in_specs=[
                pl.BlockSpec((tb, F), lambda i: (i, 0)),           # streamed x
                pl.BlockSpec((8, F), lambda i: (0, 0)),            # w1t, fetched once
                pl.BlockSpec(memory_space=pltpu.MemorySpace.SMEM),  # packed scalars
            ],
            out_specs=pl.BlockSpec((1, tb), lambda i: (0, i)),     # lane-dense out
        ),
        compiler_params=pltpu.CompilerParams(
            # Batch tiles are independent -> shard grid steps across TensorCores.
            dimension_semantics=("parallel",),
        ),
    )(x.astype(jnp.float32), w1t8, params)

    return out_row.reshape(B, 1)    # (1, B) -> (B, 1), matches the PyTorch module


def _init_params(key, num_features):
    k1, k2, k3, k4, k5, k6 = jax.random.split(key, 6)
    w1 = jax.random.normal(k1, (num_features, 4), jnp.float32) * 0.1
    b1 = jax.random.normal(k2, (4,), jnp.float32) * 0.1
    w2 = jax.random.normal(k3, (4, 2), jnp.float32) * 0.1
    b2 = jax.random.normal(k4, (2,), jnp.float32) * 0.1
    w3 = jax.random.normal(k5, (2, 1), jnp.float32) * 0.1
    b3 = jax.random.normal(k6, (1,), jnp.float32) * 0.1
    return w1, b1, w2, b2, w3, b3


def _reference(x, w1, b1, w2, b2, w3, b3):
    h1 = jnp.maximum(x @ w1 + b1, 0.0)
    h2 = jnp.maximum(h1 @ w2 + b2, 0.0)
    return h2 @ w3 + b3


if __name__ == "__main__":
    num_features = 32
    batch = 300     # small; deliberately not a multiple of the tile so the
                    # partial trailing block (no pad pass) is exercised

    key = jax.random.PRNGKey(0)
    kx, kp = jax.random.split(key)
    x = jax.random.normal(kx, (batch, num_features), jnp.float32)
    params = _init_params(kp, num_features)

    # tile_b=128 forces a multi-step, megacore-parallel grid with a ragged tail.
    out = jax.block_until_ready(mlp_forward(x, *params, tile_b=128))

    ref = _reference(x, *params)
    assert out.shape == (batch, 1)
    assert jnp.allclose(out, ref, atol=1e-4, rtol=1e-4), \
        float(jnp.max(jnp.abs(out - ref)))

    print("KERNEL_OK")
</pallas_src>

<mosaic_0001>
module attributes {stable_mosaic.version = 11 : i64} {
  func.func @mlp_kernel(%arg0: i32, %arg1: memref<128x32xf32, #tpu.memory_space<vmem>>, %arg2: memref<8x32xf32, #tpu.memory_space<vmem>>, %arg3: memref<17xf32, #tpu.memory_space<smem>>, %arg4: memref<1x128xf32, #tpu.memory_space<vmem>>) attributes {dimension_semantics = [#tpu.dimension_semantics<parallel>], iteration_bounds = array<i64: 3>, scalar_prefetch = 0 : i64, scratch_operands = 0 : i64, tpu.core_type = #tpu.core_type<tc>, window_params = [{transform_indices = @transform_0, window_bounds = array<i64: 128, 32>}, {pipeline_mode = #tpu.pipeline_mode<synchronous>, transform_indices = @transform_1, window_bounds = array<i64: 8, 32>}, {transform_indices = @transform_2, window_bounds = array<i64: 17>}, {transform_indices = @transform_3, window_bounds = array<i64: 1, 128>}]} {
    %c0 = arith.constant 0 : index
    %c0_0 = arith.constant 0 : index
    %0 = vector.load %arg2[%c0, %c0_0] : memref<8x32xf32, #tpu.memory_space<vmem>>, vector<8x32xf32>
    %c0_1 = arith.constant 0 : index
    %c0_2 = arith.constant 0 : index
    %1 = vector.load %arg1[%c0_1, %c0_2] : memref<128x32xf32, #tpu.memory_space<vmem>>, vector<128x32xf32>
    %cst = arith.constant dense<0.000000e+00> : vector<8x128xf32>
    %2 = tpu.matmul %0, %1, %cst {dimension_numbers = #tpu.dot_dimension_numbers<[1], [1], [0], [0], [0, 0, 1, 0], [], []>} : vector<8x32xf32>, vector<128x32xf32>, vector<8x128xf32> -> vector<8x128xf32>
    %3 = vector.extract_strided_slice %2 {offsets = [0, 0], sizes = [1, 128], strides = [1, 1]} : vector<8x128xf32> to vector<1x128xf32>
    %c0_3 = arith.constant 0 : index
    %4 = memref.load %arg3[%c0_3] : memref<17xf32, #tpu.memory_space<smem>>
    %5 = vector.broadcast %4 : f32 to vector<1x128xf32>
    %6 = arith.addf %3, %5 : vector<1x128xf32>
    %cst_4 = arith.constant 0.000000e+00 : f32
    %7 = vector.broadcast %cst_4 : f32 to vector<1x128xf32>
    %8 = arith.maximumf %6, %7 : vector<1x128xf32>
    %9 = vector.extract_strided_slice %2 {offsets = [1, 0], sizes = [1, 128], strides = [1, 1]} : vector<8x128xf32> to vector<1x128xf32>
    %c1 = arith.constant 1 : index
    %10 = memref.load %arg3[%c1] : memref<17xf32, #tpu.memory_space<smem>>
    %11 = vector.broadcast %10 : f32 to vector<1x128xf32>
    %12 = arith.addf %9, %11 : vector<1x128xf32>
    %cst_5 = arith.constant 0.000000e+00 : f32
    %13 = vector.broadcast %cst_5 : f32 to vector<1x128xf32>
    %14 = arith.maximumf %12, %13 : vector<1x128xf32>
    %15 = vector.extract_strided_slice %2 {offsets = [2, 0], sizes = [1, 128], strides = [1, 1]} : vector<8x128xf32> to vector<1x128xf32>
    %c2 = arith.constant 2 : index
    %16 = memref.load %arg3[%c2] : memref<17xf32, #tpu.memory_space<smem>>
    %17 = vector.broadcast %16 : f32 to vector<1x128xf32>
    %18 = arith.addf %15, %17 : vector<1x128xf32>
    %cst_6 = arith.constant 0.000000e+00 : f32
    %19 = vector.broadcast %cst_6 : f32 to vector<1x128xf32>
    %20 = arith.maximumf %18, %19 : vector<1x128xf32>
    %21 = vector.extract_strided_slice %2 {offsets = [3, 0], sizes = [1, 128], strides = [1, 1]} : vector<8x128xf32> to vector<1x128xf32>
    %c3 = arith.constant 3 : index
    %22 = memref.load %arg3[%c3] : memref<17xf32, #tpu.memory_space<smem>>
    %23 = vector.broadcast %22 : f32 to vector<1x128xf32>
    %24 = arith.addf %21, %23 : vector<1x128xf32>
    %cst_7 = arith.constant 0.000000e+00 : f32
    %25 = vector.broadcast %cst_7 : f32 to vector<1x128xf32>
    %26 = arith.maximumf %24, %25 : vector<1x128xf32>
    %c4 = arith.constant 4 : index
    %27 = memref.load %arg3[%c4] : memref<17xf32, #tpu.memory_space<smem>>
    %28 = vector.broadcast %27 : f32 to vector<1x128xf32>
    %29 = arith.mulf %8, %28 : vector<1x128xf32>
    %c6 = arith.constant 6 : index
    %30 = memref.load %arg3[%c6] : memref<17xf32, #tpu.memory_space<smem>>
    %31 = vector.broadcast %30 : f32 to vector<1x128xf32>
    %32 = arith.mulf %14, %31 : vector<1x128xf32>
    %33 = arith.addf %29, %32 : vector<1x128xf32>
    %c8 = arith.constant 8 : index
    %34 = memref.load %arg3[%c8] : memref<17xf32, #tpu.memory_space<smem>>
    %35 = vector.broadcast %34 : f32 to vector<1x128xf32>
    %36 = arith.mulf %20, %35 : vector<1x128xf32>
    %37 = arith.addf %33, %36 : vector<1x128xf32>
    %c10 = arith.constant 10 : index
    %38 = memref.load %arg3[%c10] : memref<17xf32, #tpu.memory_space<smem>>
    %39 = vector.broadcast %38 : f32 to vector<1x128xf32>
    %40 = arith.mulf %26, %39 : vector<1x128xf32>
    %41 = arith.addf %37, %40 : vector<1x128xf32>
    %c12 = arith.constant 12 : index
    %42 = memref.load %arg3[%c12] : memref<17xf32, #tpu.memory_space<smem>>
    %43 = vector.broadcast %42 : f32 to vector<1x128xf32>
    %44 = arith.addf %41, %43 : vector<1x128xf32>
    %cst_8 = arith.constant 0.000000e+00 : f32
    %45 = vector.broadcast %cst_8 : f32 to vector<1x128xf32>
    %46 = arith.maximumf %44, %45 : vector<1x128xf32>
    %c5 = arith.constant 5 : index
    %47 = memref.load %arg3[%c5] : memref<17xf32, #tpu.memory_space<smem>>
    %48 = vector.broadcast %47 : f32 to vector<1x128xf32>
    %49 = arith.mulf %8, %48 : vector<1x128xf32>
    %c7 = arith.constant 7 : index
    %50 = memref.load %arg3[%c7] : memref<17xf32, #tpu.memory_space<smem>>
    %51 = vector.broadcast %50 : f32 to vector<1x128xf32>
    %52 = arith.mulf %14, %51 : vector<1x128xf32>
    %53 = arith.addf %49, %52 : vector<1x128xf32>
    %c9 = arith.constant 9 : index
    %54 = memref.load %arg3[%c9] : memref<17xf32, #tpu.memory_space<smem>>
    %55 = vector.broadcast %54 : f32 to vector<1x128xf32>
    %56 = arith.mulf %20, %55 : vector<1x128xf32>
    %57 = arith.addf %53, %56 : vector<1x128xf32>
    %c11 = arith.constant 11 : index
    %58 = memref.load %arg3[%c11] : memref<17xf32, #tpu.memory_space<smem>>
    %59 = vector.broadcast %58 : f32 to vector<1x128xf32>
    %60 = arith.mulf %26, %59 : vector<1x128xf32>
    %61 = arith.addf %57, %60 : vector<1x128xf32>
    %c13 = arith.constant 13 : index
    %62 = memref.load %arg3[%c13] : memref<17xf32, #tpu.memory_space<smem>>
    %63 = vector.broadcast %62 : f32 to vector<1x128xf32>
    %64 = arith.addf %61, %63 : vector<1x128xf32>
    %cst_9 = arith.constant 0.000000e+00 : f32
    %65 = vector.broadcast %cst_9 : f32 to vector<1x128xf32>
    %66 = arith.maximumf %64, %65 : vector<1x128xf32>
    %c14 = arith.constant 14 : index
    %67 = memref.load %arg3[%c14] : memref<17xf32, #tpu.memory_space<smem>>
    %68 = vector.broadcast %67 : f32 to vector<1x128xf32>
    %69 = arith.mulf %46, %68 : vector<1x128xf32>
    %c15 = arith.constant 15 : index
    %70 = memref.load %arg3[%c15] : memref<17xf32, #tpu.memory_space<smem>>
    %71 = vector.broadcast %70 : f32 to vector<1x128xf32>
    %72 = arith.mulf %66, %71 : vector<1x128xf32>
    %73 = arith.addf %69, %72 : vector<1x128xf32>
    %c16 = arith.constant 16 : index
    %74 = memref.load %arg3[%c16] : memref<17xf32, #tpu.memory_space<smem>>
    %75 = vector.broadcast %74 : f32 to vector<1x128xf32>
    %76 = arith.addf %73, %75 : vector<1x128xf32>
    %c0_10 = arith.constant 0 : index
    %c0_11 = arith.constant 0 : index
    %77 = vector.load %arg4[%c0_10, %c0_11] : memref<1x128xf32, #tpu.memory_space<vmem>>, vector<1x128xf32>
    tpu.vector_store %arg4[%c0_10, %c0_11], %76 {strides = array<i32>} : memref<1x128xf32, #tpu.memory_space<vmem>>, vector<1x128xf32>,
    return
  }
  func.func @transform_0(%arg0: i32) -> (i32, i32) {
    %c0_i32 = arith.constant 0 : i32
    %c0_i32_0 = arith.constant 0 : i32
    return %arg0, %c0_i32 : i32, i32
  }
  func.func @transform_1(%arg0: i32) -> (i32, i32) {
    %c0_i32 = arith.constant 0 : i32
    %c0_i32_0 = arith.constant 0 : i32
    %c0_i32_1 = arith.constant 0 : i32
    return %c0_i32, %c0_i32_0 : i32, i32
  }
  func.func @transform_2(%arg0: i32) -> i32 {
    %c0_i32 = arith.constant 0 : i32
    %c0_i32_0 = arith.constant 0 : i32
    return %c0_i32 : i32
  }
  func.func @transform_3(%arg0: i32) -> (i32, i32) {
    %c0_i32 = arith.constant 0 : i32
    %c0_i32_0 = arith.constant 0 : i32
    return %c0_i32, %arg0 : i32, i32
  }
}

</mosaic_0001>

<bundles_post_ra>
// kernel: tpu_custom_call.1
= control target key start
LH: loop header
LB: loop body
LE: loop exit
PB: predicated region body
PF: predicated region fallthrough
CT: control target
= control target key end

     0   :  { %8 = vsyncpa [#allocation4], 0  ;;  %s791_s0 = inlined_call_operand.vmem [shape: f32[300,32], index: 0, kind: input, shape index: {}]   ;;  %s792_s1 = inlined_call_operand.vmem [shape: f32[8,32], index: 1, kind: input, shape index: {}]   ;;  %s793_s2 = inlined_call_operand.vmem [shape: f32[17], index: 2, kind: input, shape index: {}]   ;;  %s794_s3 = inlined_call_operand.hbm [shape: f32[1,300], index: 3, kind: output, shape index: {}]  }
   0x1   :  { %9 = vsyncpa [#allocation3], 0 }
   0x2   :  { %11 = vsyncpa [#allocation3 + $0x1], 0  ;;  %s653_s12 = smov 0   ;;  %s655_s13 = smov 0  }
   0x3   :  { %s657_s14 = smov 0   ;;  %s659_s15 = smov 0  }
   0x4 LB: > { %s674_s16 = sadd.s32 4294967295, %s630_s15   ;;  %s456_s17 = sadd.s32 4294967294, %s630_s15   ;;  %s630_s15 = sphi %s659_s15, %s800_s15   ;;  %s626_s14 = sphi %s657_s14, %s799_s14   ;;  %s622_s13 = sphi %s655_s13, %s798_s13   ;;  %s618_s12 = sphi %s653_s12, %s797_s12  }
   0x5   : > { %s678_s18 = sadd.s32 1, %s630_s15   ;;  %s92_s19 = sadd.s32 1, %s626_s14 }
   0x6   : > { %s89_s20 = ssub.s32 %s630_s15, %s678_s18  ;;  %p102_p0 = scmp.ne.s32.totalorder %s626_s14, %s622_s13 }
   0x7   : > { %p90_p1 = scmp.eq.s32.totalorder %s89_s20, 0  ;;  %p103_p2 = scmp.eq.s32.totalorder %s674_s16, 2 }
   0x8   : > { %p108_p3 = scmp.ne.s32.totalorder %s622_s13, %s618_s12  ;;  %p109_p4 = scmp.eq.s32.totalorder %s456_s17, 2 }
   0x9   : > { %s689_s21 = scalar_select %p90_p1, %s626_s14, %s92_s19  }
   0xa   : > { %p691_p5 = por %p103_p2, %p102_p0  ;;  %p695_p6 = por %p109_p4, %p108_p3 }
   0xb   : > { %p457_p7 = scmp.ge.s32.totalorder %s630_s15, 1  ;;  %p116_p8 = scmp.lt.s32.totalorder %s630_s15, 4 }
   0xc   : > { %p513_p9 = scmp.eq.s32.totalorder %s674_s16, 0  ;;  %s131_s26 = sshll.u32 %s793_s2, 4  ;;  %s132_s26 = int_to_ptr.vmem [resolvable:$true] %s131_s26 }
   0xd   : > { %p117_p10 = pnand %p457_p7, %p116_p8  ;;  %s632_s27 = smov [#allocation2]  }
   0xf   : > { %p505_p11 = pneg %p117_p10  ;;  %161 = sbr.rel (%p117_p10) target bundleno = 246 (0xf6), region = 32 }
  0x11   : > { %p506_p12 = pnand %p513_p9, %p505_p11 }
  0x13   : > { %508 = dma.vmem_to_smem (!%p506_p12), %s132_s26, 16, %s632_s27, [#allocation4]  }
  0x14   : > { %609 = dma.done.wait (%p513_p9), [#allocation4], 16  }
  0x15   : > { %611 = vsyncadd (%p513_p9), [#allocation4], 4294967280 }
  0x16   : > { %168 = sfence }
  0x17   : > { %s462_s28 = sshll.u32 %s674_s16, 4  ;;  %vm221_vm0 = vcmask 261120   ;;  %v204_v16 = vld [vmem:[%s792_s1] sm:$0xff]  ;;  %s293_s8 = sld [smem:[#allocation2]] }
  0x18   : > { %p195_p13 = scmp.lt.s32.totalorder %s462_s28, 37  ;;  %s481_s9 = sld [smem:[#allocation2 + $0x1]] }
  0x19   : > { %s482_s10 = sld [smem:[#allocation2 + $0x2]]  ;;  %s188_s7 = sand.u32 1, %s622_s13  }
  0x1a   : > { %s802_s28 = smov (!%p195_p13, %s462_s28), 37  ;;  %s483_s11 = sld [smem:[#allocation2 + $0x3]] }
  0x1b   : > { %s463_s29 = sshll.u32 %s802_s28, 3  ;;  %s747_s17 = sld [smem:[#allocation2 + $0x4]] }
  0x1c   : > { %s709_s5 = scalar_lea.vmem %s791_s0, %s463_s29  ;;  %s485_s19 = sld [smem:[#allocation2 + $0x6]] }
  0x1d   : > { %v220_v0 = vld [vmem:[%s709_s5 + $0x78] sm:$0xff]  ;;  %v219_v1 = vld [vmem:[%s709_s5 + $0x70] sm:$0xff]  ;;  %v218_v2 = vld [vmem:[%s709_s5 + $0x68] sm:$0xff]  ;;  %s486_s20 = sld [smem:[#allocation2 + $0x8]]  ;;  %v294_v17 = vstv %s293_s8 }
  0x1e   : > { %464 = vmatpush.xpose.msk.msra.mxu0 %vm221_vm0, %v220_v0  ;;  %v217_v3 = vld [vmem:[%s709_s5 + $0x60] sm:$0xff]  ;;  %v216_v4 = vld [vmem:[%s709_s5 + $0x58] sm:$0xff]  ;;  %v215_v5 = vld [vmem:[%s709_s5 + $0x50] sm:$0xff]  ;;  %s490_s24 = sld [smem:[#allocation2 + $0x7]]  ;;  %v298_v18 = vstv %s481_s9 }
  0x1f   : > { %v214_v6 = vld [vmem:[%s709_s5 + $0x48] sm:$0xff]  ;;  %v213_v7 = vld [vmem:[%s709_s5 + $0x40] sm:$0xff]  ;;  %v212_v8 = vld [vmem:[%s709_s5 + $0x38] sm:$0xff]  ;;  %s491_s25 = sld [smem:[#allocation2 + $0x9]]  ;;  %v302_v19 = vstv %s482_s10  ;;  %s385_s10 = scalar_lea.hbm %s794_s3, %s674_s16 }
  0x20   : > { %v211_v9 = vld [vmem:[%s709_s5 + $0x30] sm:$0xff]  ;;  %v210_v10 = vld [vmem:[%s709_s5 + $0x28] sm:$0xff]  ;;  %v209_v11 = vld [vmem:[%s709_s5 + $0x20] sm:$0xff]  ;;  %s749_s26 = sld [smem:[#allocation2 + $0xa]]  ;;  %v306_v20 = vstv %s483_s11  ;;  %s189_s11 = scalar_lea.vmem [#allocation5], %s188_s7 }
  0x21   : > { %v208_v12 = vld [vmem:[%s709_s5 + $0x18] sm:$0xff]  ;;  %v207_v13 = vld [vmem:[%s709_s5 + $0x10] sm:$0xff]  ;;  %v206_v14 = vld [vmem:[%s709_s5 + $0x8] sm:$0xff]  ;;  %s751_s27 = sld [smem:[#allocation2 + $0x5]]  ;;  %v310_v34 = vstv %s747_s17  ;;  %s387_s17 = sshll.u32 %s189_s11, 4  ;;  %s388_s17 = int_to_ptr.vmem [resolvable:$true] %s387_s17 }
  0x22   : > { %465 = vmatpush.xpose.msk.msra.mxu0 %vm221_vm0, %v219_v1  ;;  %v205_v15 = vld [vmem:[%s709_s5] sm:$0xff]  ;;  %s753_s28 = sld [smem:[#allocation2 + $0xb]]  ;;  %v313_v26 = vstv %s485_s19  ;;  %s389_s19 = sshll.u32 %s385_s10, 4  ;;  %s390_s19 = int_to_ptr.hbm [resolvable:$true] %s389_s19 }
  0x23   : > { %v320_v27 = vstv %s486_s20  ;;  %s488_s29 = sld [smem:[#allocation2 + $0xc]]  ;;  %s377_s20 = scalar_lea.sflag [#allocation3], %s188_s7 }
  0x24   : > { %v341_v28 = vstv %s490_s24  ;;  %s493_s30 = sld [smem:[#allocation2 + $0xd]]  ;;  %s578_s24 = sshra.s32 %s390_s19, 4  ;;  %s579_s24 = int_to_ptr.hbm [resolvable:$true] %s578_s24 }
  0x25   : > { %v348_v29 = vstv %s491_s25  ;;  %s494_s4 = sld [smem:[#allocation2 + $0xe]]  ;;  %s580_s25 = scalar_lea.hbm %s579_s24, 1 }
  0x26   : > { %466 = vmatpush.xpose.msk.msra.mxu0 %vm221_vm0, %v218_v2  ;;  %v327_v35 = vstv %s749_s26  ;;  %s495_s5 = sld [smem:[#allocation2 + $0xf]]  ;;  %p581_p0 = scmp.ne.s32.totalorder %s579_s24, %s580_s25 }
  0x27   : > { %v338_v38 = vstv %s751_s27  ;;  %s496_s6 = sld [smem:[#allocation2 + $0x10]]  ;;  %s584_s27 = scalar_lea.hbm %s794_s3, 3 }
  0x28   : > { %v355_v39 = vstv %s753_s28  ;;  %p582_p1 = pnand %p581_p0, %p691_p5  ;;  %p585_p3 = scmp.lt.s32.totalorder %s579_s24, %s794_s3 }
  0x29   : > { %v334_v54 = vstv %s488_s29  ;;  %p586_p4 = scmp.lt.s32.totalorder %s584_s27, %s580_s25 }
  0x2a   : > { %467 = vmatpush.xpose.msk.msra.mxu0 %vm221_vm0, %v217_v3  ;;  %v362_v58 = vstv %s493_s30  ;;  %p583_p2 = pneg %p582_p1 }
  0x2b   : > { %v366_v62 = vstv %s494_s4  ;;  %p587_p7 = por %p586_p4, %p585_p3 }
  0x2c   : > { %v369_v0 = vstv %s495_s5 }
  0x2d   : > { %p588_p8 = pnand %p587_p7, %p583_p2 }
  0x2e   : > { %468 = vmatpush.xpose.msk.msra.mxu0 %vm221_vm0, %v216_v4  ;;  %v373_v4 = vstv %s496_s6 }
  0x32   : > { %469 = vmatpush.xpose.msk.msra.mxu0 %vm221_vm0, %v215_v5 }
  0x36   : > { %470 = vmatpush.xpose.msk.msra.mxu0 %vm221_vm0, %v214_v6 }
  0x3a   : > { %471 = vmatpush.xpose.msk.msra.mxu0 %vm221_vm0, %v213_v7 }
  0x3e   : > { %472 = vmatpush.xpose.msk.msra.mxu0 %vm221_vm0, %v212_v8 }
  0x42   : > { %473 = vmatpush.xpose.msk.msra.mxu0 %vm221_vm0, %v211_v9 }
  0x46   : > { %474 = vmatpush.xpose.msk.msra.mxu0 %vm221_vm0, %v210_v10 }
  0x4a   : > { %475 = vmatpush.xpose.msk.msra.mxu0 %vm221_vm0, %v209_v11 }
  0x4e   : > { %476 = vmatpush.xpose.msk.msra.mxu0 %vm221_vm0, %v208_v12 }
  0x52   : > { %477 = vmatpush.xpose.msk.msra.mxu0 %vm221_vm0, %v207_v13 }
  0x56   : > { %478 = vmatpush.xpose.msk.msra.mxu0 %vm221_vm0, %v206_v14 }
  0x5a   : > { %479 = vmatpush.xpose.msk.msra.mxu0 %vm221_vm0, %v205_v15 }
  0x5d   : > { %480 = vmatmul.msk.f32.vlgmr.msra.gmra.mxu0 %vm221_vm0, %v204_v16 }
  0xda   : > { %v290_v21 = vpop.f32.mrf.mxu0 }
  0xdb   : > { %v295_v22 = vadd.f32 %v294_v17, %v290_v21  ;;  %v299_v23 = vadd.f32 %v298_v18, %v290_v21  ;;  %v303_v24 = vadd.f32 %v302_v19, %v290_v21  ;;  %v307_v25 = vadd.f32 %v306_v20, %v290_v21 }
  0xdd   : > { %v296_v30 = vmax.f32 %v295_v22, 0.0  ;;  %v300_v31 = vmax.f32 %v299_v23, 0.0  ;;  %v304_v32 = vmax.f32 %v303_v24, 0.0  ;;  %v308_v33 = vmax.f32 %v307_v25, 0.0 }
  0xdf   : > { %v314_v36 = vmul.f32 %v313_v26, %v300_v31  ;;  %v321_v37 = vmul.f32 %v320_v27, %v304_v32  ;;  %v342_v40 = vmul.f32 %v341_v28, %v300_v31  ;;  %v349_v41 = vmul.f32 %v348_v29, %v304_v32 }
  0xe0   : > { %v311_v42 = vmul.f32 %v310_v34, %v296_v30  ;;  %v328_v44 = vmul.f32 %v327_v35, %v308_v33  ;;  %v339_v45 = vmul.f32 %v338_v38, %v296_v30  ;;  %v356_v47 = vmul.f32 %v355_v39, %v308_v33 }
  0xe1   : > { %v316_v43 = vrot.slane %v314_v36, 1  ;;  %v344_v46 = vrot.slane %v342_v40, 1  ;;  %v323_v49 = vrot.slane %v321_v37, 2  ;;  %v351_v51 = vrot.slane %v349_v41, 2 }
  0xe2   : > { %v330_v53 = vrot.slane %v328_v44, 3  ;;  %v358_v56 = vrot.slane %v356_v47, 3 }
  0xe3   : > { %v318_v48 = vadd.f32 %v316_v43, %v311_v42  ;;  %v346_v50 = vadd.f32 %v344_v46, %v339_v45 }
  0xe5   : > { %v325_v52 = vadd.f32 %v323_v49, %v318_v48  ;;  %v353_v55 = vadd.f32 %v351_v51, %v346_v50 }
  0xe7   : > { %v332_v57 = vadd.f32 %v330_v53, %v325_v52  ;;  %v360_v59 = vadd.f32 %v358_v56, %v353_v55 }
  0xe9   : > { %v335_v60 = vadd.f32 %v334_v54, %v332_v57  ;;  %v363_v61 = vadd.f32 %v362_v58, %v360_v59 }
  0xeb   : > { %v336_v63 = vmax.f32 %v335_v60, 0.0  ;;  %v364_v1 = vmax.f32 %v363_v61, 0.0 }
  0xed   : > { %v367_v2 = vmul.f32 %v366_v62, %v336_v63  ;;  %v370_v3 = vmul.f32 %v369_v0, %v364_v1 }
  0xef   : > { %v371_v5 = vadd.f32 %v370_v3, %v367_v2 }
  0xf1   : > { %v374_v6 = vadd.f32 %v373_v4, %v371_v5 }
  0xf3   : > { %375 = vst [vmem:[%s189_s11] sm:$0x1] %v374_v6 }
  0xf4   : > { %591 = shalt.err (!%p588_p8)
}
  0xf5   : > { %503 = dma.vmem_to_hbm [thread:$0]  (%p691_p5), %s388_s17, 16, %s390_s19, %s377_s20  }
  0xf6 PF: > { %p515_p9 = scmp.ge.s32.totalorder %s630_s15, 2  ;;  %s401_s30 = sand.u32 1, %s618_s12  }
  0xf7   : > { %s402_s4 = scalar_lea.sflag [#allocation3], %s401_s30 }
  0xf8   : > { %p510_p10 = pnand %p515_p9, %p695_p6 }
  0xfa   : > { %p511_p11 = pneg %p510_p10 }
  0xfc   : > { %613 = dma.done.wait (%p511_p11), %s402_s4, 16  }
  0xfd   : > { %615 = vsyncadd (%p511_p11), %s402_s4, 4294967280  ;;  %p14_p12 = scmp.ge.s32.totalorder %s678_s18, 5   ;;  %s797_s12 = smov %s622_s13 }
  0xfe   : > { %s798_s13 = smov %s626_s14  ;;  %s799_s14 = smov %s689_s21 }
  0xff   : > { %s800_s15 = smov %s678_s18  ;;  %16 = sbr.rel (!%p14_p12) target bundleno = 4 (0x4), region = 72 }
 0x104   :  { %407 = vsyncpa [#allocation3], 1 }
 0x105   :  { %409 = vsyncpa [#allocation3 + $0x1], 1 }
 0x106   :  { %410 = vsyncpa [#allocation4], 1 }
 0x107   :  { %412 = vsyncpa [#allocation4 + $0x1], 1 }

</bundles_post_ra>
